<compile_context>
chip_gen: v7x
topology: tpu7x:2x2x1
jax: 0.10.0
libtpu: 0.0.40
codegen_flags: <defaults>
</compile_context>

<pallas_src>
import functools

import jax
import jax.numpy as jnp
from jax.experimental import pallas as pl
from jax.experimental.pallas import tpu as pltpu

LANE = 128
SUB = 8
TILE_R = 4096                    # rows per stream tile: 2 MiB f32 / 1 MiB bf16
NCHUNK = 2                       # parallel chunks for dual-TC parts (v7x); harmless on 1-TC parts
VMEM_LIMIT = 40 * 1024 * 1024    # scoped VMEM; worst-case live set here is ~25 MiB (<= 64 MiB v7x)
BUF_DT = jnp.bfloat16            # storage dtype of fisher/prev/omega/W buffers (f32 math in-kernel)


def _round_up(x, m):
    return ((x + m - 1) // m) * m


# ----------------------------------------------------------------------------
# Pallas kernels
# ----------------------------------------------------------------------------
def _linear_fwd_kernel(x_ref, w_ref, b_ref, o_ref, acc_ref):
    # y = x @ W + b, tiled over (M, N, K), bf16 MXU inputs, f32 accumulator.
    k = pl.program_id(2)

    @pl.when(k == 0)
    def _():
        acc_ref[...] = jnp.zeros_like(acc_ref)

    acc_ref[...] += jnp.dot(x_ref[...], w_ref[...],
                            preferred_element_type=jnp.float32)

    @pl.when(k == pl.num_programs(2) - 1)
    def _():
        o_ref[...] = (acc_ref[...] + b_ref[...].astype(jnp.float32)).astype(o_ref.dtype)


def _weighted_sqdiff_sum_kernel(a_ref, b_ref, c_ref, o_ref, acc_ref, *, scale):
    # Per-chunk accumulation of scale * sum(a * (b - c)**2).
    # Grid = (chunk [parallel], tile-within-chunk [arbitrary/reduction]).
    # Inputs may be bf16 (upcast here); accumulation is f32.
    ti = pl.program_id(1)

    @pl.when(ti == 0)
    def _():
        acc_ref[...] = jnp.zeros_like(acc_ref)

    a = a_ref[...].astype(jnp.float32)
    d = b_ref[...].astype(jnp.float32) - c_ref[...].astype(jnp.float32)
    contrib = a * d * d
    # (tile_r,128) -> (tile_r//8, 8, 128) then sum over slabs: pure vreg-aligned
    # VPU adds; no per-tile cross-sublane XLU reduce.  The wrapper does the
    # final tiny (8*nchunk,128) -> scalar sum.
    acc_ref[...] += jnp.sum(contrib.reshape(-1, SUB, LANE), axis=0)

    @pl.when(ti == pl.num_programs(1) - 1)
    def _():
        o_ref[...] = scale * acc_ref[...]


def _si_omega_kernel(w_ref, p_ref, prev_ref, omega_ref, out_ref, *, epsilon):
    # omega_new = omega + W / ((p - p_prev)**2 + epsilon); f32 math, bf16 storage.
    d = p_ref[...].astype(jnp.float32) - prev_ref[...].astype(jnp.float32)
    add = w_ref[...].astype(jnp.float32) * pl.reciprocal(d * d + epsilon, approx=False)
    out_ref[...] = (omega_ref[...].astype(jnp.float32) + add).astype(out_ref.dtype)


# ----------------------------------------------------------------------------
# Pallas wrappers (jitted)
# ----------------------------------------------------------------------------
@functools.partial(jax.jit, static_argnames=("tm", "tn", "tk"))
def _linear_forward_padded(xp, wp, bp, *, tm, tn, tk):
    """y = xp @ wp + bp on pre-padded, alignment-friendly operands."""
    Mp, Kp = xp.shape
    Np = wp.shape[1]
    return pl.pallas_call(
        _linear_fwd_kernel,
        out_shape=jax.ShapeDtypeStruct((Mp, Np), jnp.float32),
        grid=(Mp // tm, Np // tn, Kp // tk),
        in_specs=[
            pl.BlockSpec((tm, tk), lambda i, j, k: (i, k)),
            pl.BlockSpec((tk, tn), lambda i, j, k: (k, j)),
            pl.BlockSpec((1, tn), lambda i, j, k: (0, j)),
        ],
        out_specs=pl.BlockSpec((tm, tn), lambda i, j, k: (i, j)),
        scratch_shapes=[pltpu.VMEM((tm, tn), jnp.float32)],
        compiler_params=pltpu.CompilerParams(
            dimension_semantics=("parallel", "parallel", "arbitrary"),
            vmem_limit_bytes=VMEM_LIMIT),
    )(xp, wp, bp)


@functools.partial(jax.jit, static_argnames=("scale",))
def weighted_sqdiff_sum(a, b, c, *, scale=1.0):
    """scale * sum(a * (b - c)**2) over (R, 128) arrays; R % 8 == 0, any dtypes."""
    R = a.shape[0]
    assert R % SUB == 0
    tile_r = R if R <= TILE_R else TILE_R
    num_tiles = R // tile_r           # exact: flatten_pad pads large arrays to NCHUNK*TILE_R rows
    nchunk = NCHUNK if (num_tiles >= NCHUNK and num_tiles % NCHUNK == 0) else 1
    tpc = num_tiles // nchunk         # tiles per chunk

    spec = pl.BlockSpec((tile_r, LANE), lambda ci, ti: (ci * tpc + ti, 0))
    kern = functools.partial(_weighted_sqdiff_sum_kernel, scale=float(scale))
    out = pl.pallas_call(
        kern,
        out_shape=jax.ShapeDtypeStruct((nchunk * SUB, LANE), jnp.float32),
        grid=(nchunk, tpc),
        in_specs=[spec, spec, spec],
        out_specs=pl.BlockSpec((SUB, LANE), lambda ci, ti: (ci, 0)),
        scratch_shapes=[pltpu.VMEM((SUB, LANE), jnp.float32)],
        compiler_params=pltpu.CompilerParams(
            dimension_semantics=("parallel", "arbitrary"),
            vmem_limit_bytes=VMEM_LIMIT),
    )(a, b, c)
    return jnp.sum(out)


@functools.partial(jax.jit, static_argnames=("epsilon",), donate_argnums=(3,))
def si_omega_update(w_flat, p_flat, prev_flat, omega_flat, *, epsilon):
    """omega_new = omega + W / ((p - p_prev)**2 + epsilon).

    omega is donated and aliased (input_output_aliases) -> updated in place.
    """
    R = w_flat.shape[0]
    tile_r = R if R <= TILE_R else TILE_R
    grid = (R // tile_r,)
    spec = pl.BlockSpec((tile_r, LANE), lambda i: (i, 0))
    kern = functools.partial(_si_omega_kernel, epsilon=float(epsilon))
    return pl.pallas_call(
        kern,
        out_shape=jax.ShapeDtypeStruct((R, LANE), omega_flat.dtype),
        grid=grid,
        in_specs=[spec] * 4,
        out_specs=spec,
        input_output_aliases={3: 0},
        compiler_params=pltpu.CompilerParams(
            dimension_semantics=("parallel",),
            vmem_limit_bytes=VMEM_LIMIT),
    )(w_flat, p_flat, prev_flat, omega_flat)


# ----------------------------------------------------------------------------
# Flattening helpers (glue, plain JAX)
# ----------------------------------------------------------------------------
def flatten_pad(arrs, dtype=jnp.float32):
    """Flatten params row-major, zero-pad, view as (R, 128).

    Padding granularity is SUB*LANE (1024 elems) for small parameter sets and
    NCHUNK*TILE_R rows for large ones, so the streaming kernels always see an
    integral, dual-TC-chunkable tile count with minimal dead-zero traffic.
    """
    flat = jnp.concatenate([a.reshape(-1).astype(jnp.float32) for a in arrs])
    n = flat.shape[0]
    rows = _round_up(-(-n // LANE), SUB)
    if rows > TILE_R:
        rows = _round_up(rows, NCHUNK * TILE_R)
    pad = rows * LANE - n
    return jnp.pad(flat, (0, pad)).reshape(rows, LANE).astype(dtype), n


# ----------------------------------------------------------------------------
# ContinualLearner (JAX/Pallas version)
# ----------------------------------------------------------------------------
class ContinualLearner:
    def __init__(self, in_features, num_classes, key):
        self.si_c = 0
        self.epsilon = 0.1
        self.ewc_lambda = 0
        self.gamma = 1.0
        self.online = True
        self.fisher_n = None
        self.emp_FI = False
        self.EWC_task_count = 0
        kw, _ = jax.random.split(key)
        # TODO(synk): forward() is abstract in the PyTorch module; a minimal
        # linear classifier head is used here so forward() is concrete.
        self.params = {
            "fc__weight": 0.01
            * jax.random.normal(kw, (in_features, num_classes), jnp.float32),
            "fc__bias": jnp.zeros((num_classes,), jnp.float32),
        }
        self._buffers = {}
        self._flat_cache = None
        self._fwd_cache = None
        self._refresh_caches()
        # TODO(synk): XdG (mask_dict / excit_buffer_list) has no compute here; omitted.

    # ---- parameter management -------------------------------------------
    def set_params(self, new_params):
        self.params = dict(new_params)
        self._refresh_caches()

    def _refresh_caches(self):
        self._flat_cache = None  # flat (R,128) view is rebuilt lazily
        # Padded bf16 weight / f32 bias for the MXU forward, built once per set_params.
        w = self.params["fc__weight"].astype(jnp.float32)
        b = self.params["fc__bias"].astype(jnp.float32)
        K, N = w.shape
        tn = min(256, _round_up(N, LANE))
        tk = min(512, _round_up(K, LANE))
        Np, Kp = _round_up(N, tn), _round_up(K, tk)
        wp = jnp.pad(w, ((0, Kp - K), (0, Np - N))).astype(jnp.bfloat16)
        bp = jnp.pad(b, (0, Np - N)).reshape(1, Np)
        self._fwd_cache = (wp, bp, K, N, tn, tk)

    def _param_flat(self):
        if self._flat_cache is None:
            self._flat_cache = flatten_pad(list(self.params.values()))
        return self._flat_cache

    # ---- forward ----------------------------------------------------------
    def forward(self, x_nchw):
        B = x_nchw.shape[0]
        x2d = x_nchw.reshape(B, -1).astype(jnp.float32)
        wp, bp, K, N, tn, tk = self._fwd_cache
        Kp = wp.shape[0]
        tm = min(256, _round_up(B, 16))   # 16-row granularity for bf16 sublane packing
        Mp = _round_up(B, tm)
        xp = jnp.pad(x2d, ((0, Mp - B), (0, Kp - K))).astype(jnp.bfloat16)
        out = _linear_forward_padded(xp, wp, bp, tm=tm, tn=tn, tk=tk)
        return out[:B, :N]

    # ---- EWC ----------------------------------------------------------------
    def register_ewc_buffers(self, fisher_flat):
        # TODO(synk): estimate_fisher() needs autograd + a data loader; only the
        # buffer-registration / online-accumulation part is reproduced here.
        p_flat, _ = self._param_flat()
        fisher_f32 = fisher_flat.astype(jnp.float32)
        if self.online and self.EWC_task_count == 1:
            fisher_f32 = fisher_f32 + self.gamma * self._buffers[
                "EWC_estimated_fisher"].astype(jnp.float32)
        suffix = "" if self.online else str(self.EWC_task_count + 1)
        # Buffers stored bf16 (halves HBM bytes); kernels upcast to f32.
        self._buffers["EWC_prev_task" + suffix] = p_flat.astype(BUF_DT)
        self._buffers["EWC_estimated_fisher" + suffix] = fisher_f32.astype(BUF_DT)
        self.EWC_task_count = 1 if self.online else self.EWC_task_count + 1

    def ewc_loss(self):
        if self.EWC_task_count > 0:
            p_flat, _ = self._param_flat()
            total = jnp.float32(0.0)
            # TODO(synk): offline multi-task EWC could stack fisher/prev along a
            # leading task axis so p_flat is streamed once; online (default) is 1 task.
            for task in range(1, self.EWC_task_count + 1):
                suffix = "" if self.online else str(task)
                mean = self._buffers["EWC_prev_task" + suffix]
                fisher = self._buffers["EWC_estimated_fisher" + suffix]
                g = self.gamma if self.online else 1.0
                total = total + weighted_sqdiff_sum(fisher, p_flat, mean, scale=float(g))
            return 0.5 * total
        return jnp.float32(0.0)

    # ---- SI -----------------------------------------------------------------
    def update_omega(self, W_flat, epsilon):
        p_flat, _ = self._param_flat()
        p_prev = self._buffers["SI_prev_task"]
        omega = self._buffers.pop("SI_omega", None)   # drop ref: omega gets donated below
        if omega is None:
            omega = jnp.zeros(p_flat.shape, BUF_DT)
        omega_new = si_omega_update(W_flat.astype(BUF_DT), p_flat, p_prev, omega,
                                    epsilon=float(epsilon))
        self._buffers["SI_prev_task"] = p_flat.astype(BUF_DT)
        self._buffers["SI_omega"] = omega_new

    def surrogate_loss(self):
        if "SI_prev_task" in self._buffers and "SI_omega" in self._buffers:
            p_flat, _ = self._param_flat()
            return weighted_sqdiff_sum(self._buffers["SI_omega"], p_flat,
                                       self._buffers["SI_prev_task"], scale=1.0)
        return jnp.float32(0.0)


# ----------------------------------------------------------------------------
if __name__ == "__main__":
    key = jax.random.PRNGKey(0)
    k_x, k_m, k_f, k_prev, k_w = jax.random.split(key, 5)

    B, C, H, W = 2, 4, 16, 16
    in_features = C * H * W
    num_classes = 16

    x = jax.random.normal(k_x, (B, C, H, W), jnp.float32)
    model = ContinualLearner(in_features, num_classes, k_m)

    # --- forward (MXU kernel, bf16 inputs, f32 accumulate) ---
    y = jax.block_until_ready(model.forward(x))
    assert y.shape == (B, num_classes)
    y_ref = x.reshape(B, -1) @ model.params["fc__weight"] + model.params["fc__bias"]
    assert jnp.allclose(y, y_ref, rtol=3e-2, atol=5e-3), "forward mismatch"

    # --- EWC ---
    p_flat, n_real = model._param_flat()
    fisher_flat = jnp.abs(jax.random.normal(k_f, p_flat.shape, jnp.float32))
    fisher_flat = fisher_flat.reshape(-1).at[n_real:].set(0.0).reshape(p_flat.shape)
    model.register_ewc_buffers(fisher_flat)
    # perturb params so the loss is non-trivial (set_params -> cache refresh)
    model.set_params({**model.params, "fc__weight": model.params["fc__weight"] + 0.05})
    ewc = jax.block_until_ready(model.ewc_loss())
    p2, _ = model._param_flat()
    fisher_b = model._buffers["EWC_estimated_fisher"].astype(jnp.float32)
    prev_b = model._buffers["EWC_prev_task"].astype(jnp.float32)
    ewc_ref = 0.5 * model.gamma * jnp.sum(fisher_b * (p2 - prev_b) ** 2)
    assert jnp.allclose(ewc, ewc_ref, rtol=1e-3, atol=1e-6), (ewc, ewc_ref)

    # --- SI ---
    prev_flat = p2 + 0.01 * jax.random.normal(k_prev, p2.shape, jnp.float32)
    model._buffers["SI_prev_task"] = prev_flat.astype(jnp.bfloat16)
    W_flat = jnp.abs(jax.random.normal(k_w, p2.shape, jnp.float32))
    W_flat = W_flat.reshape(-1).at[n_real:].set(0.0).reshape(p2.shape)
    model.update_omega(W_flat, model.epsilon)

    omega_stored = model._buffers["SI_omega"].astype(jnp.float32)
    W_b = W_flat.astype(jnp.bfloat16).astype(jnp.float32)
    prev_bb = prev_flat.astype(jnp.bfloat16).astype(jnp.float32)
    omega_ref = W_b / ((p2 - prev_bb) ** 2 + model.epsilon)
    assert jnp.allclose(omega_stored, omega_ref, rtol=1e-2, atol=1e-3), "omega mismatch"

    si = jax.block_until_ready(model.surrogate_loss())
    prev2 = model._buffers["SI_prev_task"].astype(jnp.float32)
    si_ref = jnp.sum(omega_stored * (p2 - prev2) ** 2)
    assert jnp.allclose(si, si_ref, rtol=1e-2, atol=1e-5), (si, si_ref)

    assert jnp.isfinite(ewc) and jnp.isfinite(si)
    print("KERNEL_OK")
</pallas_src>

<mosaic_0001>
module attributes {stable_mosaic.version = 11 : i64} {
  func.func @_linear_fwd_kernel(%arg0: i32, %arg1: i32, %arg2: i32, %arg3: memref<16x512xbf16, #tpu.memory_space<vmem>>, %arg4: memref<512x128xbf16, #tpu.memory_space<vmem>>, %arg5: memref<1x128xf32, #tpu.memory_space<vmem>>, %arg6: memref<16x128xf32, #tpu.memory_space<vmem>>, %arg7: memref<16x128xf32, #tpu.memory_space<vmem>>) attributes {dimension_semantics = [#tpu.dimension_semantics<parallel>, #tpu.dimension_semantics<parallel>, #tpu.dimension_semantics<arbitrary>], iteration_bounds = array<i64: 1, 1, 2>, scalar_prefetch = 0 : i64, scratch_operands = 1 : i64, tpu.core_type = #tpu.core_type<tc>, window_params = [{transform_indices = @transform_0, window_bounds = array<i64: 16, 512>}, {transform_indices = @transform_1, window_bounds = array<i64: 512, 128>}, {transform_indices = @transform_2, window_bounds = array<i64: 1, 128>}, {transform_indices = @transform_3, window_bounds = array<i64: 16, 128>}]} {
    %c0_i32 = arith.constant 0 : i32
    %0 = arith.cmpi eq, %arg2, %c0_i32 : i32
    %1 = arith.extui %0 : i1 to i32
    %c0_i32_0 = arith.constant 0 : i32
    %2 = arith.cmpi ne, %1, %c0_i32_0 : i32
    scf.if %2 {
      %cst_9 = arith.constant 0.000000e+00 : f32
      %12 = vector.broadcast %cst_9 : f32 to vector<16x128xf32>
      %c0_10 = arith.constant 0 : index
      %c0_11 = arith.constant 0 : index
      %13 = vector.load %arg7[%c0_10, %c0_11] : memref<16x128xf32, #tpu.memory_space<vmem>>, vector<16x128xf32>
      tpu.vector_store %arg7[%c0_10, %c0_11], %12 {strides = array<i32>} : memref<16x128xf32, #tpu.memory_space<vmem>>, vector<16x128xf32>,
    } else {
    }
    %c0 = arith.constant 0 : index
    %c0_1 = arith.constant 0 : index
    %3 = vector.load %arg7[%c0, %c0_1] : memref<16x128xf32, #tpu.memory_space<vmem>>, vector<16x128xf32>
    %c0_2 = arith.constant 0 : index
    %c0_3 = arith.constant 0 : index
    %4 = vector.load %arg3[%c0_2, %c0_3] : memref<16x512xbf16, #tpu.memory_space<vmem>>, vector<16x512xbf16>
    %c0_4 = arith.constant 0 : index
    %c0_5 = arith.constant 0 : index
    %5 = vector.load %arg4[%c0_4, %c0_5] : memref<512x128xbf16, #tpu.memory_space<vmem>>, vector<512x128xbf16>
    %cst = arith.constant dense<0.000000e+00> : vector<16x128xf32>
    %6 = tpu.matmul %4, %5, %cst {dimension_numbers = #tpu.dot_dimension_numbers<[1], [0], [0], [1], [0, 0, 1, 1], [], []>} : vector<16x512xbf16>, vector<512x128xbf16>, vector<16x128xf32> -> vector<16x128xf32>
    %7 = arith.addf %3, %6 : vector<16x128xf32>
    %c0_6 = arith.constant 0 : index
    %c0_7 = arith.constant 0 : index
    %8 = vector.load %arg7[%c0_6, %c0_7] : memref<16x128xf32, #tpu.memory_space<vmem>>, vector<16x128xf32>
    tpu.vector_store %arg7[%c0_6, %c0_7], %7 {strides = array<i32>} : memref<16x128xf32, #tpu.memory_space<vmem>>, vector<16x128xf32>,
    %c1_i32 = arith.constant 1 : i32
    %9 = arith.cmpi eq, %arg2, %c1_i32 : i32
    %10 = arith.extui %9 : i1 to i32
    %c0_i32_8 = arith.constant 0 : i32
    %11 = arith.cmpi ne, %10, %c0_i32_8 : i32
    scf.if %11 {
      %c0_9 = arith.constant 0 : index
      %c0_10 = arith.constant 0 : index
      %12 = vector.load %arg7[%c0_9, %c0_10] : memref<16x128xf32, #tpu.memory_space<vmem>>, vector<16x128xf32>
      %c0_11 = arith.constant 0 : index
      %c0_12 = arith.constant 0 : index
      %13 = vector.load %arg5[%c0_11, %c0_12] : memref<1x128xf32, #tpu.memory_space<vmem>>, vector<1x128xf32>
      %14 = vector.broadcast %13 : vector<1x128xf32> to vector<16x128xf32>
      %15 = arith.addf %12, %14 : vector<16x128xf32>
      %c0_13 = arith.constant 0 : index
      %c0_14 = arith.constant 0 : index
      %16 = vector.load %arg6[%c0_13, %c0_14] : memref<16x128xf32, #tpu.memory_space<vmem>>, vector<16x128xf32>
      tpu.vector_store %arg6[%c0_13, %c0_14], %15 {strides = array<i32>} : memref<16x128xf32, #tpu.memory_space<vmem>>, vector<16x128xf32>,
    } else {
    }
    return
  }
  func.func @transform_0(%arg0: i32, %arg1: i32, %arg2: i32) -> (i32, i32) {
    %c0_i32 = arith.constant 0 : i32
    return %arg0, %arg2 : i32, i32
  }
  func.func @transform_1(%arg0: i32, %arg1: i32, %arg2: i32) -> (i32, i32) {
    %c0_i32 = arith.constant 0 : i32
    return %arg2, %arg1 : i32, i32
  }
  func.func @transform_2(%arg0: i32, %arg1: i32, %arg2: i32) -> (i32, i32) {
    %c0_i32 = arith.constant 0 : i32
    %c0_i32_0 = arith.constant 0 : i32
    return %c0_i32, %arg1 : i32, i32
  }
  func.func @transform_3(%arg0: i32, %arg1: i32, %arg2: i32) -> (i32, i32) {
    %c0_i32 = arith.constant 0 : i32
    return %arg0, %arg1 : i32, i32
  }
}

</mosaic_0001>

<bundles_post_ra>
// kernel: _linear_forward_padded.1
= control target key start
LH: loop header
LB: loop body
LE: loop exit
PB: predicated region body
PF: predicated region fallthrough
CT: control target
= control target key end

     0   :  { %8 = vsyncpa [#allocation4], 0  ;;  %s1416_s0 = inlined_call_operand.hbm [shape: bf16[16,1024], index: 0, kind: input, shape index: {}]   ;;  %s1417_s1 = inlined_call_operand.hbm [shape: bf16[1024,128], index: 1, kind: input, shape index: {}]   ;;  %s1418_s2 = inlined_call_operand.vmem [shape: f32[1,128], index: 2, kind: input, shape index: {}]   ;;  %s1419_s3 = inlined_call_operand.hbm [shape: f32[16,128], index: 3, kind: output, shape index: {}]  }
   0x1   :  { %10 = vsyncpa [#allocation4 + $0x1], 0 }
   0x2   :  { %11 = vsyncpa [#allocation7], 0 }
   0x3   :  { %13 = vsyncpa [#allocation7 + $0x1], 0 }
   0x4   :  { %14 = vsyncpa [#allocation5], 0  ;;  %s1172_s12 = smov 0   ;;  %s1174_s13 = smov 0  }
   0x5   :  { %s1176_s14 = smov 0   ;;  %s1178_s15 = smov 0  }
   0x6   :  { %s1180_s16 = smov 0   ;;  %s1182_s17 = smov 0  }
   0x7 LB: > { %s780_s18 = sadd.s32 4294967295, %s1139_s17   ;;  %s32_s19 = sadd.s32 1, %s1135_s16  ;;  %s1139_s17 = sphi %s1182_s17, %s20_s17   ;;  %s1135_s16 = sphi %s1180_s16, %s1432_s16   ;;  %s1131_s15 = sphi %s1178_s15, %s1431_s15   ;;  %s1127_s14 = sphi %s1176_s14, %s1430_s14   ;;  %s1123_s13 = sphi %s1174_s13, %s1429_s13   ;;  %s1119_s12 = sphi %s1172_s12, %s1428_s12  }
   0x8   : > { %p33_p0 = scmp.ge.s32.totalorder %s32_s19, 2  ;;  %s48_s20 = sadd.s32 1, %s1127_s14 }
   0x9   : > { %p55_p1 = scmp.ne.s32.totalorder %s1127_s14, %s1123_s13  ;;  %p56_p2 = scmp.eq.s32.totalorder %s1139_s17, 0 }
   0xa   : > { %s1434_s19 = smov (%p33_p0, %s32_s19), 0  ;;  %p61_p4 = scmp.ne.s32.totalorder %s1123_s13, %s1119_s12 }
   0xb   : > { %p1208_p3 = por %p56_p2, %p55_p1  ;;  %s44_s22 = ssub.s32 %s1135_s16, %s1434_s19 }
   0xc   : > { %p62_p5 = scmp.eq.s32.totalorder %s780_s18, 0  ;;  %p46_p6 = scmp.eq.s32.totalorder %s44_s22, 0 }
   0xd   : > { %p897_p8 = scmp.lt.s32.totalorder %s1139_s17, 2  ;;  %s1226_s25 = sand.u32 1, %s1127_s14  }
   0xe   : > { %p1217_p7 = por %p62_p5, %p61_p4  ;;  %s836_s26 = sshll.u32 %s1135_s16, 8 }
   0xf   : > { %s1223_s24 = scalar_select %p46_p6, %s1127_s14, %s48_s20  }
  0x10   : > { %s1422_s23 = scalar_select %p1217_p7, 1, 0 }
  0x11   : > { %s784_s27 = sshll.u32 %s1226_s25, 5  ;;  %s1233_s30 = scalar_lea.hbm %s1416_s0, %s836_s26 }
  0x12   : > { %s177_s4 = scalar_lea.vmem [#allocation3], %s784_s27  ;;  %p1237_p9 = pnand %p897_p8, %p1208_p3 }
  0x13   : > { %s187_s5 = sshll.u32 %s177_s4, 4  ;;  %s174_s7 = scalar_lea.sflag [#allocation4], %s1226_s25  ;;  %s1241_s5 = int_to_ptr.vmem [resolvable:$true] %s187_s5 }
  0x14   : > { %s995_s8 = scalar_lea.hbm %s1233_s30, 512  ;;  %p997_p12 = pneg %p1237_p9 }
  0x15   : > { %p996_p11 = scmp.ne.s32.totalorder %s1233_s30, %s995_s8  ;;  %s1000_s11 = scalar_lea.hbm %s1416_s0, 1024 }
  0x16   : > { %p1001_p1 = scmp.lt.u32.totalorder %s1233_s30, %s1416_s0  ;;  %p1002_p2 = scmp.lt.u32.totalorder %s1000_s11, %s995_s8 }
  0x17   : > { %p998_p13 = pnand %p997_p12, %p996_p11  ;;  %p1004_p4 = scmp.lt.u32.totalorder %s995_s8, %s1233_s30 }
  0x18   : > { %p1003_p3 = por %p1002_p2, %p1001_p1 }
  0x19   : > { %p999_p0 = pneg %p998_p13 }
  0x1a   : > { %p1005_p5 = por %p1004_p4, %p1003_p3 }
  0x1c   : > { %p1006_p6 = pnand %p1005_p5, %p999_p0 }
  0x1e   : > { %1009 = shalt.err (!%p1006_p6)
}
  0x1f   : > { %s1010_s21 = scalar_lea.vmem %s1241_s5, 512  ;;  %s1141_s22 = smov [#allocation3]  }
  0x20   : > { %p1011_p8 = scmp.ne.s32.totalorder %s1241_s5, %s1010_s21  ;;  %s1015_s26 = sshll.u32 %s1141_s22, 4  ;;  %s1016_s26 = int_to_ptr.vmem [resolvable:$false] %s1015_s26 }
  0x21   : > { %s1017_s27 = scalar_lea.vmem %s1016_s26, 1024  ;;  %p1018_p10 = scmp.lt.s32.totalorder %s1241_s5, %s1016_s26 }
  0x22   : > { %p1013_p11 = pnand %p1011_p8, %p997_p12  ;;  %p1019_p1 = scmp.lt.s32.totalorder %s1017_s27, %s1010_s21 }
  0x24   : > { %p1014_p13 = pneg %p1013_p11  ;;  %p1020_p2 = por %p1019_p1, %p1018_p10 }
  0x26   : > { %p1021_p3 = pnand %p1020_p2, %p1014_p13 }
  0x28   : > { %1024 = shalt.err (!%p1021_p3)
}
  0x29   : > { %s1142_s28 = smov 512   ;;  %s1143_s29 = smov 256  }
  0x2a   : > { %s1144_s4 = smov 16   ;;  %p217_p0 = scmp.lt.s32.totalorder %s1139_s17, 3 }
  0x2b   : > { %893 = dma.hbm_to_vmem [thread:$0]  (!%p1237_p9), %s1233_s30, 512, %s1241_s5, %s174_s7, %s1142_s28, %s1143_s29, %s1144_s4  }
  0x2c   : > { %s787_s8 = sshll.u32 %s1226_s25, 8  ;;  %s837_s9 = sshll.u32 %s1135_s16, 12 }
  0x2d   : > { %p1424_p10 = scmp.ge.s32.totalorder %s1139_s17, 1  ;;  %s1284_s20 = scalar_lea.hbm %s1417_s1, %s837_s9 }
  0x2e   : > { %s201_s21 = scalar_lea.vmem [#allocation6], %s787_s8  ;;  %s198_s30 = scalar_lea.sflag [#allocation7], %s1226_s25 }
  0x2f   : > { %p1277_p4 = pnand %p1424_p10, %p217_p0  ;;  %s209_s22 = sshll.u32 %s201_s21, 4  ;;  %s1286_s22 = int_to_ptr.vmem [resolvable:$true] %s209_s22 }
  0x30   : > { %s1025_s5 = scalar_lea.hbm %s1284_s20, 4096  ;;  %s1030_s27 = scalar_lea.hbm %s1417_s1, 8192 }
  0x31   : > { %p1026_p5 = scmp.ne.s32.totalorder %s1284_s20, %s1025_s5  ;;  %p1031_p11 = scmp.lt.u32.totalorder %s1284_s20, %s1417_s1 }
  0x32   : > { %p1032_p13 = scmp.lt.u32.totalorder %s1030_s27, %s1025_s5  ;;  %p1034_p2 = scmp.lt.u32.totalorder %s1025_s5, %s1284_s20 }
  0x33   : > { %p1028_p6 = pnand %p1026_p5, %p997_p12 }
  0x34   : > { %p1033_p1 = por %p1032_p13, %p1031_p11 }
  0x35   : > { %p1029_p8 = pneg %p1028_p6 }
  0x36   : > { %p1035_p3 = por %p1034_p2, %p1033_p1 }
  0x38   : > { %p1036_p0 = pnand %p1035_p3, %p1029_p8 }
  0x3a   : > { %1039 = shalt.err (!%p1036_p0)
}
  0x3b   : > { %s1040_s4 = scalar_lea.vmem %s1286_s22, 4096  ;;  %s1145_s8 = smov [#allocation6]  }
  0x3c   : > { %p1041_p10 = scmp.ne.s32.totalorder %s1286_s22, %s1040_s4  ;;  %s1045_s9 = sshll.u32 %s1145_s8, 4  ;;  %s1046_s9 = int_to_ptr.vmem [resolvable:$false] %s1045_s9 }
  0x3d   : > { %s1047_s11 = scalar_lea.vmem %s1046_s9, 8192  ;;  %p1048_p7 = scmp.lt.s32.totalorder %s1286_s22, %s1046_s9 }
  0x3e   : > { %p1043_p5 = pnand %p1041_p10, %p997_p12  ;;  %p1049_p11 = scmp.lt.s32.totalorder %s1047_s11, %s1040_s4 }
  0x40   : > { %p1044_p6 = pneg %p1043_p5  ;;  %p1050_p13 = por %p1049_p11, %p1048_p7 }
  0x42   : > { %p1051_p1 = pnand %p1050_p13, %p1044_p6 }
  0x44   : > { %1054 = shalt.err (!%p1051_p1)
}
  0x45   : > { %s1146_s12 = smov 64   ;;  %s1147_s21 = smov 4  }
  0x46   : > { %896 = dma.hbm_to_vmem [thread:$0]  (!%p1237_p9), %s1284_s20, 4096, %s1286_s22, %s198_s30, %s1146_s12, %s1146_s12, %s1147_s21  }
  0x47   : > { %221 = sbr.rel (%p1277_p4) target bundleno = 384 (0x180), region = 32  ;;  %s223_s5 = sand.u32 (!%p1277_p4), 1, %s1123_s13  }
  0x48   : > { %s791_s7 = sshll.u32 (!%p1277_p4), %s223_s5, 5  ;;  %s224_s26 = scalar_lea.sflag (!%p1277_p4), [#allocation4], %s223_s5 }
  0x49   : > { %s1317_s27 = scalar_lea.vmem (!%p1277_p4), [#allocation3], %s791_s7  ;;  %p1426_p7 = scmp.ne.s32.totalorder (!%p1277_p4), %s1422_s23, 0 }
  0x4e   : > { %1106 = dma.done.wait (%p1426_p7), %s224_s26, 512  }
  0x4f   : > { %1108 = vsyncadd (%p1426_p7), %s224_s26, 4294966784  ;;  %s792_s28 = sshll.u32 %s223_s5, 8  ;;  %s233_s6 = scalar_lea.sflag [#allocation7], %s223_s5 }
  0x50   : > { %s1323_s25 = scalar_lea.vmem [#allocation6], %s792_s28 }
  0x51   : > { %1110 = dma.done.wait (%p1426_p7), %s233_s6, 4096  }
  0x52   : > { %1112 = vsyncadd (%p1426_p7), %s233_s6, 4294963200  ;;  %p793_p9 = scmp.ne.s32.totalorder %s1131_s15, 0 }
  0x53   : > { %v1148_v0 = vmov (!%p793_p9), 0.0  }
  0x54   : > { %273 = sbr.rel (%p793_p9) target bundleno = 91 (0x5b), region = 44  ;;  %274 = vst [vmem:[#allocation2] sm:$0xff] (!%p793_p9), %v1148_v0  ;;  %275 = vst [vmem:[#allocation2 + $0x8] sm:$0xff] (!%p793_p9), %v1148_v0 }
  0x5b PF: > { %v957_v1 = vld [vmem:[%s1323_s25 + $0x40] sm:$0xff]   ;;  %v961_v5 = vld [vmem:[%s1323_s25 + $0x48] sm:$0xff]   ;;  %v965_v9 = vld [vmem:[%s1323_s25 + $0x50] sm:$0xff]   ;;  %p830_p12 = scmp.ne.s32.totalorder %s1131_s15, 1 }
  0x5c   : > { %v958_v2 = vld [vmem:[%s1323_s25 + $0xc0] sm:$0xff]   ;;  %838 = vmatprep.subr.bf16.mxu0 %v957_v1  ;;  %v962_v6 = vld [vmem:[%s1323_s25 + $0xc8] sm:$0xff]   ;;  %v966_v10 = vld [vmem:[%s1323_s25 + $0xd0] sm:$0xff]  }
  0x5d   : > { %v959_v3 = vld [vmem:[%s1323_s25] sm:$0xff]   ;;  %860 = vmatprep.subr.bf16.mxu1 %v958_v2  ;;  %v963_v7 = vld [vmem:[%s1323_s25 + $0x8] sm:$0xff]   ;;  %v967_v11 = vld [vmem:[%s1323_s25 + $0x10] sm:$0xff]  }
  0x5e   : > { %v960_v4 = vld [vmem:[%s1323_s25 + $0x80] sm:$0xff]   ;;  %839 = vmatpush3.bf16.msra.mxu0 %v959_v3  ;;  %v964_v8 = vld [vmem:[%s1323_s25 + $0x88] sm:$0xff]   ;;  %v968_v12 = vld [vmem:[%s1323_s25 + $0x90] sm:$0xff]  }
  0x5f   : > { %861 = vmatpush3.bf16.msra.mxu1 %v960_v4  ;;  %840 = vmatprep.subr.bf16.mxu0 %v961_v5  ;;  %v969_v13 = vld [vmem:[%s1323_s25 + $0x58] sm:$0xff]   ;;  %v973_v17 = vld [vmem:[%s1323_s25 + $0x60] sm:$0xff]   ;;  %v977_v21 = vld [vmem:[%s1323_s25 + $0x68] sm:$0xff]  }
  0x60   : > { %862 = vmatprep.subr.bf16.mxu1 %v962_v6  ;;  %v970_v14 = vld [vmem:[%s1323_s25 + $0xd8] sm:$0xff]   ;;  %v974_v18 = vld [vmem:[%s1323_s25 + $0xe0] sm:$0xff]   ;;  %v978_v22 = vld [vmem:[%s1323_s25 + $0xe8] sm:$0xff]  }
  0x61   : > { %v971_v15 = vld [vmem:[%s1323_s25 + $0x18] sm:$0xff]   ;;  %v975_v19 = vld [vmem:[%s1323_s25 + $0x20] sm:$0xff]   ;;  %v979_v23 = vld [vmem:[%s1323_s25 + $0x28] sm:$0xff]  }
  0x62   : > { %841 = vmatpush3.bf16.msra.mxu0 %v963_v7  ;;  %v972_v16 = vld [vmem:[%s1323_s25 + $0x98] sm:$0xff]   ;;  %v976_v20 = vld [vmem:[%s1323_s25 + $0xa0] sm:$0xff]   ;;  %v980_v24 = vld [vmem:[%s1323_s25 + $0xa8] sm:$0xff]  }
  0x63   : > { %863 = vmatpush3.bf16.msra.mxu1 %v964_v8  ;;  %842 = vmatprep.subr.bf16.mxu0 %v965_v9  ;;  %v981_v25 = vld [vmem:[%s1323_s25 + $0x70] sm:$0xff]   ;;  %v985_v29 = vld [vmem:[%s1323_s25 + $0x78] sm:$0xff]  }
  0x64   : > { %864 = vmatprep.subr.bf16.mxu1 %v966_v10  ;;  %v982_v26 = vld [vmem:[%s1323_s25 + $0xf0] sm:$0xff]   ;;  %v986_v30 = vld [vmem:[%s1323_s25 + $0xf8] sm:$0xff]  }
  0x65   : > { %v983_v27 = vld [vmem:[%s1323_s25 + $0x30] sm:$0xff]   ;;  %v987_v31 = vld [vmem:[%s1323_s25 + $0x38] sm:$0xff]  }
  0x66   : > { %843 = vmatpush3.bf16.msra.mxu0 %v967_v11  ;;  %v984_v28 = vld [vmem:[%s1323_s25 + $0xb0] sm:$0xff]   ;;  %v988_v32 = vld [vmem:[%s1323_s25 + $0xb8] sm:$0xff]  }
  0x67   : > { %865 = vmatpush3.bf16.msra.mxu1 %v968_v12  ;;  %844 = vmatprep.subr.bf16.mxu0 %v969_v13  ;;  %v989_v33 = vld [vmem:[%s1317_s27] ss:$16 sps:$4 sm:$0xff]   ;;  %v991_v34 = vld [vmem:[%s1317_s27 + $0x4] ss:$16 sps:$4 sm:$0xff]   ;;  %v992_v35 = vld [vmem:[%s1317_s27 + $0x8] ss:$16 sps:$4 sm:$0xff]  }
  0x68   : > { %866 = vmatprep.subr.bf16.mxu1 %v970_v14  ;;  %v994_v36 = vld [vmem:[%s1317_s27 + $0xc] ss:$16 sps:$4 sm:$0xff]   ;;  %590 = vmatprep.mubr.bf16.mxu0 %v991_v34  ;;  %v276_v46 = vld [vmem:[#allocation2] sm:$0xff] }
  0x69   : > { %631 = vmatprep.mubr.bf16.mxu1 %v994_v36  ;;  %v277_v51 = vld [vmem:[#allocation2 + $0x8] sm:$0xff]  ;;  %v831_v56 = vld [vmem:[%s1418_s2] ss:$0 sm:$0xff] (!%p830_p12) }
  0x6a   : > { %845 = vmatpush3.bf16.msra.mxu0 %v971_v15 }
  0x6b   : > { %867 = vmatpush3.bf16.msra.mxu1 %v972_v16  ;;  %846 = vmatprep.subr.bf16.mxu0 %v973_v17 }
  0x6c   : > { %868 = vmatprep.subr.bf16.mxu1 %v974_v18 }
  0x6e   : > { %847 = vmatpush3.bf16.msra.mxu0 %v975_v19 }
  0x6f   : > { %869 = vmatpush3.bf16.msra.mxu1 %v976_v20  ;;  %848 = vmatprep.subr.bf16.mxu0 %v977_v21 }
  0x70   : > { %870 = vmatprep.subr.bf16.mxu1 %v978_v22 }
  0x72   : > { %849 = vmatpush3.bf16.msra.mxu0 %v979_v23 }
  0x73   : > { %871 = vmatpush3.bf16.msra.mxu1 %v980_v24  ;;  %850 = vmatprep.subr.bf16.mxu0 %v981_v25 }
  0x74   : > { %872 = vmatprep.subr.bf16.mxu1 %v982_v26 }
  0x76   : > { %851 = vmatpush3.bf16.msra.mxu0 %v983_v27 }
  0x77   : > { %873 = vmatpush3.bf16.msra.mxu1 %v984_v28  ;;  %852 = vmatprep.subr.bf16.mxu0 %v985_v29 }
  0x78   : > { %874 = vmatprep.subr.bf16.mxu1 %v986_v30 }
  0x7a   : > { %853 = vmatpush3.bf16.msra.mxu0 %v987_v31 }
  0x7b   : > { %875 = vmatpush3.bf16.msra.mxu1 %v988_v32 }
  0x7d   : > { %591 = vmatmul.mubr.bf16.vlgmr.msra.gmra.mrb[0].mxu0 %v989_v33 }
  0x7e   : > { %632 = vmatmul.mubr.bf16.vlgmr.msra.gmra.mrb[0].mxu1 %v992_v35 }
 0x150   : > { %v854_v37 = vpop.f32.mrb[0].mxu0 }
 0x151   : > { %v876_v38 = vpop.f32.mrb[0].mxu1  ;;  %v855_v39 = vpop.f32.mrb[1].mxu0 }
 0x152   : > { %v856_v40 = vadd.f32 %v855_v39, %v854_v37  ;;  %v877_v41 = vpop.f32.mrb[1].mxu1  ;;  %v857_v42 = vpop.f32.mrb[2].mxu0 }
 0x153   : > { %v878_v43 = vadd.f32 %v877_v41, %v876_v38  ;;  %v879_v44 = vpop.f32.mrb[2].mxu1  ;;  %v858_v45 = vpop.f32.mrb[3].mxu0 }
 0x154   : > { %v859_v47 = vadd.f32 %v858_v45, %v857_v42  ;;  %v880_v48 = vpop.f32.mrb[3].mxu1 }
 0x155   : > { %v634_v49 = vadd.f32 %v878_v43, %v856_v40  ;;  %v881_v50 = vadd.f32 %v880_v48, %v879_v44  ;;  %647 = sbr.rel (%p830_p12) target bundleno = 358 (0x166), region = 48 }
 0x157   : > { %v640_v52 = vadd.f32 %v634_v49, %v276_v46  ;;  %v637_v53 = vadd.f32 %v881_v50, %v859_v47 }
 0x159   : > { %642 = vst [vmem:[#allocation2] sm:$0xff] %v640_v52  ;;  %v641_v54 = vadd.f32 %v637_v53, %v277_v51 }
 0x15b   : > { %643 = vst [vmem:[#allocation2 + $0x8] sm:$0xff] %v641_v54 }
 0x160   : > { %v648_v55 = vld [vmem:[#allocation2] sm:$0xff] }
 0x161   : > { %v657_v58 = vadd.f32 %v831_v56, %v648_v55 }
 0x162   : > { %v649_v57 = vld [vmem:[#allocation2 + $0x8] sm:$0xff] }
 0x163   : > { %v658_v59 = vadd.f32 %v831_v56, %v649_v57  ;;  %659 = vst [vmem:[#allocation8] sm:$0xff] %v657_v58 }
 0x165   : > { %660 = vst [vmem:[#allocation8 + $0x8] sm:$0xff] %v658_v59 }
 0x166 PF: > { %p1372_p4 = scmp.eq.s32.totalorder %s780_s18, 1  ;;  %s1149_s15 = smov [#allocation8]  }
 0x167   : > { %s671_s22 = sshll.u32 %s1149_s15, 4  ;;  %s672_s22 = int_to_ptr.vmem [resolvable:$true] %s671_s22 }
 0x168   : > { %s1055_s30 = scalar_lea.vmem %s672_s22, 256  ;;  %p1062_p0 = scmp.lt.s32.totalorder %s672_s22, %s672_s22 }
 0x169   : > { %p1056_p8 = scmp.ne.s32.totalorder %s672_s22, %s1055_s30  ;;  %p1063_p10 = scmp.lt.s32.totalorder %s1055_s30, %s1055_s30 }
 0x16b   : > { %p1057_p2 = pnand %p1056_p8, %p1372_p4  ;;  %p1064_p5 = por %p1063_p10, %p1062_p0 }
 0x16d   : > { %p1058_p3 = pneg %p1057_p2 }
 0x16f   : > { %p1065_p6 = pnand %p1064_p5, %p1058_p3 }
 0x171   : > { %1068 = shalt.err (!%p1065_p6)
}
 0x172   : > { %s1069_s18 = scalar_lea.hbm %s1419_s3, 256 }
 0x173   : > { %p1070_p11 = scmp.ne.s32.totalorder %s1419_s3, %s1069_s18  ;;  %p1075_p7 = scmp.lt.u32.totalorder %s1069_s18, %s1419_s3 }
 0x175   : > { %p1071_p13 = pnand %p1070_p11, %p1372_p4 }
 0x177   : > { %p1072_p1 = pneg %p1071_p13 }
 0x179   : > { %p1077_p9 = pnand %p1075_p7, %p1072_p1 }
 0x17b   : > { %1080 = shalt.err (!%p1077_p9)
}
 0x17c   : > { %s1150_s21 = smov 128   ;;  %s1151_s5 = smov 8  }
 0x17d   : > { %887 = dma.vmem_to_hbm [thread:$0]  (%p1372_p4), %s672_s22, 256, %s1419_s3, [#allocation5], %s1150_s21, %s1150_s21, %s1151_s5  }
 0x17e   : > { %1114 = dma.done.wait (%p1372_p4), [#allocation5], 256  }
 0x17f   : > { %1116 = vsyncadd (%p1372_p4), [#allocation5], 4294967040 }
 0x180 PF: > { %s20_s17 = sadd.s32 1, %s1139_s17   ;;  %s1428_s12 = smov %s1123_s13 }
 0x181   : > { %p17_p12 = scmp.ge.s32.totalorder %s20_s17, 4   ;;  %s1429_s13 = smov %s1127_s14 }
 0x182   : > { %s1430_s14 = smov %s1223_s24  ;;  %s1431_s15 = smov %s1135_s16 }
 0x183   : > { %s1432_s16 = smov %s1434_s19  ;;  %19 = sbr.rel (!%p17_p12) target bundleno = 7 (0x7), region = 94 }
 0x18a   :  { %687 = vsyncpa [#allocation4], 1 }
 0x18b   :  { %689 = vsyncpa [#allocation4 + $0x1], 1 }
 0x18c   :  { %690 = vsyncpa [#allocation7], 1 }
 0x18d   :  { %692 = vsyncpa [#allocation7 + $0x1], 1 }
 0x18e   :  { %693 = vsyncpa [#allocation5], 1 }
 0x18f   :  { %695 = vsyncpa [#allocation5 + $0x1], 1 }

</bundles_post_ra>
